<compile_context>
chip_gen: v7x
topology: tpu7x:2x2x1
jax: 0.10.0
libtpu: 0.0.40
codegen_flags: <defaults>
</compile_context>

<pallas_src>
import jax
import jax.numpy as jnp
from jax import lax
from jax.experimental import pallas as pl
from jax.experimental.pallas import tpu as pltpu

SMOOTH = 1.0
_LANES = 128


def _cdiv(a: int, b: int) -> int:
    return -(-a // b)


def _round_up(a: int, b: int) -> int:
    return _cdiv(a, b) * b


def _physical_vmem_bytes() -> int:
    """Best-effort physical VMEM query; conservative (v7x) default on failure."""
    try:
        info = pltpu.get_tpu_info()
        v = getattr(info, "vmem_capacity_bytes", None)
        if v:
            return int(v)
    except Exception:
        pass
    return 64 << 20


def _make_dice_kernel(rows: int, tr: int, blocks_per_split: int,
                      n_splits: int, needs_mask: bool):
    """Build the per-(chunk, row-block) kernel with the tiling baked in."""

    def kernel(pred_ref, true_ref, out_ref):
        # pred_ref / true_ref: (1, tr, lanes) channel-0 tiles in VMEM.
        # out_ref: (1, 2, lanes) f32 per-chunk accumulator, resident across
        #          the (inner, "arbitrary") row-block axis.
        r = pl.program_id(1)

        @pl.when(r == 0)
        def _init():
            out_ref[...] = jnp.zeros_like(out_ref)

        p = pred_ref[...].astype(jnp.float32)
        t = true_ref[...].astype(jnp.float32)

        if needs_mask:
            c = pl.program_id(0)
            s = (c % n_splits) if n_splits > 1 else 0
            row_start = (s * blocks_per_split + r) * tr
            valid = rows - row_start  # may be <= 0 for fully-padded steps
            row_idx = lax.broadcasted_iota(jnp.int32, p.shape, 1)
            keep = row_idx < valid
            p = jnp.where(keep, p, 0.0)
            t = jnp.where(keep, t, 0.0)

        # Reduce only over the sublane (row) axis; lanes stay vectorized.
        inter = jnp.sum(p * t, axis=1, keepdims=True)   # (1, 1, lanes)
        sumpt = jnp.sum(p + t, axis=1, keepdims=True)   # (1, 1, lanes)
        out_ref[...] += jnp.concatenate([inter, sumpt], axis=1)

    return kernel


def dice_loss(y_pred: jax.Array, y_true: jax.Array, *,
              tile_rows: int | None = None,
              n_splits: int | None = None) -> jax.Array:
    """Pallas implementation of DiceLoss.forward for NCHW inputs.

    Pass bf16 inputs straight through if the producer emits them (the kernel
    upcasts in VMEM); never downcast in the wrapper.
    """
    assert y_pred.shape == y_true.shape, "y_pred and y_true must match in shape"
    n, c, h, w = y_pred.shape
    hw = h * w

    # Lane-dense view when possible (free reshape over trailing dims).
    if hw % _LANES == 0:
        rows, lanes = hw // _LANES, _LANES
    else:
        rows, lanes = h, w
    y_pred = y_pred.reshape(n, c, rows, lanes)
    y_true = y_true.reshape(n, c, rows, lanes)

    itemsize = max(jnp.dtype(y_pred.dtype).itemsize, jnp.dtype(y_true.dtype).itemsize)
    phys_vmem = _physical_vmem_bytes()
    # Per-input f32-tile budget: 6 MiB on 128-MiB-VMEM chips, 4 MiB on v7x.
    per_input_budget = (6 << 20) if phys_vmem >= (100 << 20) else (4 << 20)

    # Parallel row-split so both v7x TensorCores stream when the batch is tiny.
    if n_splits is None:
        n_splits = 2 if (n == 1 and rows >= 16) else 1
    n_splits = max(1, int(n_splits))

    # Row-tile selection (multiple of 8 unless it covers all rows in one block).
    if tile_rows is None:
        budget_rows = max(8, (per_input_budget // (lanes * 4)) // 8 * 8)
        tr = min(rows, budget_rows)
    else:
        tr = min(rows, int(tile_rows))
    if n_splits > 1:
        tr = min(tr, max(8, _round_up(_cdiv(rows, n_splits), 8)))
    if tr < rows:
        tr = max(8, (tr // 8) * 8)

    blocks_total = _cdiv(rows, tr)
    blocks_per_split = _cdiv(blocks_total, n_splits)
    needs_mask = (n_splits * blocks_per_split * tr) != rows
    n_chunks = n * n_splits

    # Explicit VMEM accounting: 2 inputs x 2 pipeline buffers + ~4 f32 temps
    # of the tile + double-buffered output tiles, with headroom, capped below
    # physical VMEM.
    tile_in_bytes = tr * lanes * itemsize
    tile_f32_bytes = tr * lanes * 4
    needed = 2 * 2 * tile_in_bytes + 4 * tile_f32_bytes + 2 * 2 * 2 * lanes * 4
    vmem_limit = int(needed * 3 // 2) + (8 << 20)
    vmem_limit = max(vmem_limit, 32 << 20)
    vmem_limit = min(vmem_limit, max(24 << 20, phys_vmem - (12 << 20)))

    def in_map(ci, r):
        if n_splits > 1:
            b = ci // n_splits
            s = ci % n_splits
            blk = s * blocks_per_split + r
            blk = jnp.minimum(blk, blocks_total - 1)  # over-split steps clamp (masked)
        else:
            b = ci
            blk = r
        # (batch, channel 0, row-block, lane-block 0); channel dim squeezed.
        return (b, 0, blk, 0)

    in_spec = pl.BlockSpec((1, None, tr, lanes), in_map)
    out_spec = pl.BlockSpec((1, 2, lanes), lambda ci, r: (ci, 0, 0))

    kernel = _make_dice_kernel(rows, tr, blocks_per_split, n_splits, needs_mask)

    partials = pl.pallas_call(
        kernel,
        out_shape=jax.ShapeDtypeStruct((n_chunks, 2, lanes), jnp.float32),
        grid=(n_chunks, blocks_per_split),
        in_specs=[in_spec, in_spec],
        out_specs=out_spec,
        compiler_params=pltpu.CompilerParams(
            dimension_semantics=("parallel", "arbitrary"),
            vmem_limit_bytes=int(vmem_limit),
        ),
    )(y_pred, y_true)

    # Tiny epilogue in plain JAX: cross-lane + cross-chunk sums, dice formula.
    intersection = jnp.sum(partials[:, 0, :])
    sum_pt = jnp.sum(partials[:, 1, :])
    dsc = (2.0 * intersection + SMOOTH) / (sum_pt + SMOOTH)
    return 1.0 - dsc


if __name__ == "__main__":
    key = jax.random.PRNGKey(0)

    def ref_loss(yp, yt):
        p = yp[:, 0].astype(jnp.float32).reshape(-1)
        t = yt[:, 0].astype(jnp.float32).reshape(-1)
        inter = jnp.sum(p * t)
        return 1.0 - (2.0 * inter + SMOOTH) / (jnp.sum(p) + jnp.sum(t) + SMOOTH)

    # Case 1: demo NCHW shape, lane-dense view (H*W % 128 == 0), single block.
    k1, k2, key = jax.random.split(key, 3)
    yp = jax.nn.sigmoid(jax.random.normal(k1, (2, 4, 16, 16), dtype=jnp.float32))
    yt = (jax.random.uniform(k2, (2, 4, 16, 16), dtype=jnp.float32) > 0.5).astype(jnp.float32)
    out = dice_loss(yp, yt)
    jax.block_until_ready(out)
    ref = ref_loss(yp, yt)
    assert jnp.allclose(out, ref, atol=1e-6, rtol=1e-6), (out, ref)

    # Case 2: N=1 with a forced row split (v7x megacore path) + masked tail block.
    k1, k2, key = jax.random.split(key, 3)
    yp = jax.nn.sigmoid(jax.random.normal(k1, (1, 3, 40, 48), dtype=jnp.float32))
    yt = (jax.random.uniform(k2, (1, 3, 40, 48), dtype=jnp.float32) > 0.5).astype(jnp.float32)
    out = dice_loss(yp, yt, tile_rows=8, n_splits=2)
    jax.block_until_ready(out)
    ref = ref_loss(yp, yt)
    assert jnp.allclose(out, ref, atol=1e-6, rtol=1e-6), (out, ref)

    # Case 3: H*W not a multiple of 128 -> fallback (H, W) layout + masked tail.
    k1, k2, key = jax.random.split(key, 3)
    yp = jax.nn.sigmoid(jax.random.normal(k1, (2, 1, 20, 30), dtype=jnp.float32))
    yt = (jax.random.uniform(k2, (2, 1, 20, 30), dtype=jnp.float32) > 0.5).astype(jnp.float32)
    out = dice_loss(yp, yt, tile_rows=8)
    jax.block_until_ready(out)
    ref = ref_loss(yp, yt)
    assert jnp.allclose(out, ref, atol=1e-6, rtol=1e-6), (out, ref)

    print("KERNEL_OK")
</pallas_src>

<mosaic_0001>
module attributes {stable_mosaic.version = 11 : i64} {
  func.func @kernel(%arg0: i32, %arg1: i32, %arg2: memref<1x1x2x128xf32, #tpu.memory_space<vmem>>, %arg3: memref<1x1x2x128xf32, #tpu.memory_space<vmem>>, %arg4: memref<1x2x128xf32, #tpu.memory_space<vmem>>) attributes {dimension_semantics = [#tpu.dimension_semantics<parallel>, #tpu.dimension_semantics<arbitrary>], iteration_bounds = array<i64: 2, 1>, scalar_prefetch = 0 : i64, scratch_operands = 0 : i64, tpu.core_type = #tpu.core_type<tc>, window_params = [{transform_indices = @transform_0, window_bounds = array<i64: 1, 1, 2, 128>}, {transform_indices = @transform_1, window_bounds = array<i64: 1, 1, 2, 128>}, {transform_indices = @transform_2, window_bounds = array<i64: 1, 2, 128>}]} {
    %c0_i32 = arith.constant 0 : i32
    %0 = arith.cmpi eq, %arg1, %c0_i32 : i32
    %1 = arith.extui %0 : i1 to i32
    %c0_i32_0 = arith.constant 0 : i32
    %2 = arith.cmpi ne, %1, %c0_i32_0 : i32
    scf.if %2 {
      %cst_15 = arith.constant 0.000000e+00 : f32
      %17 = vector.broadcast %cst_15 : f32 to vector<1x2x128xf32>
      %c0_16 = arith.constant 0 : index
      %c0_17 = arith.constant 0 : index
      %c0_18 = arith.constant 0 : index
      %18 = vector.load %arg4[%c0_16, %c0_17, %c0_18] : memref<1x2x128xf32, #tpu.memory_space<vmem>>, vector<1x2x128xf32>
      tpu.vector_store %arg4[%c0_16, %c0_17, %c0_18], %17 {strides = array<i32>} : memref<1x2x128xf32, #tpu.memory_space<vmem>>, vector<1x2x128xf32>,
    } else {
    }
    %c0 = arith.constant 0 : index
    %c0_1 = arith.constant 0 : index
    %c0_2 = arith.constant 0 : index
    %c0_3 = arith.constant 0 : index
    %3 = vector.load %arg2[%c0, %c0_1, %c0_2, %c0_3] : memref<1x1x2x128xf32, #tpu.memory_space<vmem>>, vector<1x1x2x128xf32>
    %4 = vector.shape_cast %3 : vector<1x1x2x128xf32> to vector<1x2x128xf32>
    %c0_4 = arith.constant 0 : index
    %c0_5 = arith.constant 0 : index
    %c0_6 = arith.constant 0 : index
    %c0_7 = arith.constant 0 : index
    %5 = vector.load %arg3[%c0_4, %c0_5, %c0_6, %c0_7] : memref<1x1x2x128xf32, #tpu.memory_space<vmem>>, vector<1x1x2x128xf32>
    %6 = vector.shape_cast %5 : vector<1x1x2x128xf32> to vector<1x2x128xf32>
    %7 = arith.mulf %4, %6 : vector<1x2x128xf32>
    %cst = arith.constant dense<0.000000e+00> : vector<1x128xf32>
    %8 = vector.multi_reduction <add>, %7, %cst [1] : vector<1x2x128xf32> to vector<1x128xf32>
    %9 = vector.shape_cast %8 : vector<1x128xf32> to vector<1x1x128xf32>
    %10 = arith.addf %4, %6 : vector<1x2x128xf32>
    %cst_8 = arith.constant dense<0.000000e+00> : vector<1x128xf32>
    %11 = vector.multi_reduction <add>, %10, %cst_8 [1] : vector<1x2x128xf32> to vector<1x128xf32>
    %12 = vector.shape_cast %11 : vector<1x128xf32> to vector<1x1x128xf32>
    %c0_9 = arith.constant 0 : index
    %c0_10 = arith.constant 0 : index
    %c0_11 = arith.constant 0 : index
    %13 = vector.load %arg4[%c0_9, %c0_10, %c0_11] : memref<1x2x128xf32, #tpu.memory_space<vmem>>, vector<1x2x128xf32>
    %14 = tpu.concatenate %9, %12 in 1 : vector<1x1x128xf32>, vector<1x1x128xf32> -> vector<1x2x128xf32>
    %15 = arith.addf %13, %14 : vector<1x2x128xf32>
    %c0_12 = arith.constant 0 : index
    %c0_13 = arith.constant 0 : index
    %c0_14 = arith.constant 0 : index
    %16 = vector.load %arg4[%c0_12, %c0_13, %c0_14] : memref<1x2x128xf32, #tpu.memory_space<vmem>>, vector<1x2x128xf32>
    tpu.vector_store %arg4[%c0_12, %c0_13, %c0_14], %15 {strides = array<i32>} : memref<1x2x128xf32, #tpu.memory_space<vmem>>, vector<1x2x128xf32>,
    return
  }
  func.func @transform_0(%arg0: i32, %arg1: i32) -> (i32, i32, i32, i32) {
    %c0_i32 = arith.constant 0 : i32
    %c0_i32_0 = arith.constant 0 : i32
    %c0_i32_1 = arith.constant 0 : i32
    return %arg0, %c0_i32, %arg1, %c0_i32_0 : i32, i32, i32, i32
  }
  func.func @transform_1(%arg0: i32, %arg1: i32) -> (i32, i32, i32, i32) {
    %c0_i32 = arith.constant 0 : i32
    %c0_i32_0 = arith.constant 0 : i32
    %c0_i32_1 = arith.constant 0 : i32
    return %arg0, %c0_i32, %arg1, %c0_i32_0 : i32, i32, i32, i32
  }
  func.func @transform_2(%arg0: i32, %arg1: i32) -> (i32, i32, i32) {
    %c0_i32 = arith.constant 0 : i32
    %c0_i32_0 = arith.constant 0 : i32
    %c0_i32_1 = arith.constant 0 : i32
    return %arg0, %c0_i32, %c0_i32_0 : i32, i32, i32
  }
}

</mosaic_0001>

<bundles_post_ra>
// kernel: tpu_custom_call.1
= control target key start
LH: loop header
LB: loop body
LE: loop exit
PB: predicated region body
PF: predicated region fallthrough
CT: control target
= control target key end

     0   :  { %7 = vsyncpa [#allocation3], 0  ;;  %s845_s0 = inlined_call_operand.hbm [shape: f32[2,4,2,128], index: 0, kind: input, shape index: {}]   ;;  %s846_s1 = inlined_call_operand.hbm [shape: f32[2,4,2,128], index: 1, kind: input, shape index: {}]   ;;  %s847_s2 = inlined_call_operand.hbm [shape: f32[2,2,128], index: 2, kind: output, shape index: {}]  }
   0x1   :  { %9 = vsyncpa [#allocation3 + $0x1], 0 }
   0x2   :  { %10 = vsyncpa [#allocation6], 0 }
   0x3   :  { %12 = vsyncpa [#allocation6 + $0x1], 0 }
   0x4   :  { %13 = vsyncpa [#allocation4], 0 }
   0x5   :  { %15 = vsyncpa [#allocation4 + $0x1], 0  ;;  %s619_s9 = smov 0   ;;  %s621_s10 = smov 0  }
   0x6   :  { %s623_s11 = smov 0   ;;  %s625_s12 = smov 0  }
   0x7   :  { %s627_s13 = smov 0   ;;  %s629_s14 = smov 0  }
   0x8 LB: > { %s364_s15 = sadd.s32 4294967295, %s598_s14   ;;  %s365_s16 = sadd.s32 4294967294, %s598_s14   ;;  %s598_s14 = sphi %s629_s14, %s21_s14   ;;  %s594_s13 = sphi %s627_s13, %s867_s13   ;;  %s590_s12 = sphi %s625_s12, %s866_s12   ;;  %s586_s11 = sphi %s623_s11, %s865_s11   ;;  %s582_s10 = sphi %s621_s10, %s864_s10   ;;  %s578_s9 = sphi %s619_s9, %s863_s9  }
   0x9   : > { %s33_s17 = sadd.s32 1, %s594_s13  ;;  %s42_s18 = sadd.s32 1, %s586_s11 }
   0xa   : > { %p35_p0 = scmp.ge.s32.totalorder %s33_s17, 2  ;;  %p49_p1 = scmp.ne.s32.totalorder %s586_s11, %s582_s10 }
   0xb   : > { %p50_p2 = scmp.eq.s32.totalorder %s598_s14, 0  ;;  %p55_p3 = scmp.ne.s32.totalorder %s582_s10, %s578_s9 }
   0xc   : > { %s869_s17 = smov (%p35_p0, %s33_s17), 0  ;;  %p56_p5 = scmp.eq.s32.totalorder %s364_s15, 0 }
   0xd   : > { %p660_p4 = por %p50_p2, %p49_p1  ;;  %s37_s20 = ssub.s32 %s594_s13, %s869_s17 }
   0xe   : > { %p107_p6 = scmp.eq.s32.totalorder %s364_s15, 1  ;;  %p40_p7 = scmp.eq.s32.totalorder %s37_s20, 0 }
   0xf   : > { %p666_p8 = por %p56_p5, %p55_p3  ;;  %p113_p10 = scmp.eq.s32.totalorder %s365_s16, 1 }
  0x10   : > { %p670_p9 = por %p107_p6, %p49_p1  ;;  %p401_p13 = scmp.lt.s32.totalorder %s598_s14, 2 }
  0x11   : > { %s851_s21 = scalar_select %p666_p8, 1, 0 }
  0x12   : > { %s852_s22 = scalar_select %p670_p9, 1, 0 }
  0x13   : > { %s675_s23 = scalar_select %p40_p7, %s586_s11, %s42_s18  }
  0x14   : > { %p677_p11 = por %p113_p10, %p55_p3  ;;  %s684_s25 = sand.u32 1, %s586_s11  }
  0x15   : > { %s368_s26 = sshll.u32 %s684_s25, 1  ;;  %s382_s27 = sshll.u32 %s594_s13, 7 }
  0x16   : > { %s853_s24 = scalar_select %p677_p11, 1, 0 }
  0x17   : > { %s693_s30 = scalar_lea.hbm %s845_s0, %s382_s27  ;;  %s137_s3 = scalar_lea.vmem [#allocation2], %s368_s26 }
  0x18   : > { %s146_s4 = sshll.u32 %s137_s3, 4  ;;  %p701_p0 = pnand %p401_p13, %p660_p4  ;;  %s697_s4 = int_to_ptr.vmem [resolvable:$true] %s146_s4 }
  0x19   : > { %s134_s6 = scalar_lea.sflag [#allocation3], %s684_s25  ;;  %s452_s7 = scalar_lea.hbm %s693_s30, 32 }
  0x1a   : > { %p453_p3 = scmp.ne.s32.totalorder %s693_s30, %s452_s7  ;;  %p454_p5 = pneg %p701_p0 }
  0x1b   : > { %s457_s16 = scalar_lea.hbm %s845_s0, 256  ;;  %p458_p4 = scmp.lt.u32.totalorder %s693_s30, %s845_s0 }
  0x1c   : > { %p455_p6 = pnand %p454_p5, %p453_p3  ;;  %p459_p10 = scmp.lt.u32.totalorder %s457_s16, %s452_s7 }
  0x1d   : > { %p461_p12 = scmp.lt.u32.totalorder %s452_s7, %s693_s30 }
  0x1e   : > { %p456_p7 = pneg %p455_p6  ;;  %p460_p13 = por %p459_p10, %p458_p4 }
  0x20   : > { %p462_p1 = por %p461_p12, %p460_p13 }
  0x22   : > { %p463_p2 = pnand %p462_p1, %p456_p7 }
  0x24   : > { %466 = shalt.err (!%p463_p2)
}
  0x25   : > { %s467_s20 = scalar_lea.vmem %s697_s4, 32  ;;  %s600_s28 = smov [#allocation2]  }
  0x26   : > { %p468_p3 = scmp.ne.s32.totalorder %s697_s4, %s467_s20  ;;  %s472_s29 = sshll.u32 %s600_s28, 4  ;;  %s473_s29 = int_to_ptr.vmem [resolvable:$false] %s472_s29 }
  0x27   : > { %s474_s3 = scalar_lea.vmem %s473_s29, 64  ;;  %p475_p9 = scmp.lt.s32.totalorder %s697_s4, %s473_s29 }
  0x28   : > { %p470_p6 = pnand %p468_p3, %p454_p5  ;;  %p476_p4 = scmp.lt.s32.totalorder %s474_s3, %s467_s20 }
  0x2a   : > { %p471_p11 = pneg %p470_p6  ;;  %p477_p10 = por %p476_p4, %p475_p9 }
  0x2c   : > { %p478_p12 = pnand %p477_p10, %p471_p11 }
  0x2e   : > { %481 = shalt.err (!%p478_p12)
}
  0x2f   : > { %393 = dma.hbm_to_vmem [thread:$0]  (!%p701_p0), %s693_s30, 32, %s697_s4, %s134_s6  }
  0x30   : > { %p855_p1 = scmp.lt.s32.totalorder %s598_s14, 3  ;;  %p856_p2 = scmp.ge.s32.totalorder %s598_s14, 1 }
  0x31   : > { %s746_s16 = scalar_lea.hbm %s846_s1, %s382_s27  ;;  %s157_s18 = scalar_lea.vmem [#allocation5], %s368_s26 }
  0x32   : > { %p737_p7 = pnand %p856_p2, %p855_p1  ;;  %s166_s19 = sshll.u32 %s157_s18, 4  ;;  %s167_s19 = int_to_ptr.vmem [resolvable:$true] %s166_s19 }
  0x33   : > { %s154_s30 = scalar_lea.sflag [#allocation6], %s684_s25  ;;  %s482_s4 = scalar_lea.hbm %s746_s16, 32 }
  0x34   : > { %s857_s7 = scalar_select %p737_p7, 1, 0 }
  0x35   : > { %p483_p9 = scmp.ne.s32.totalorder %s746_s16, %s482_s4  ;;  %s487_s27 = scalar_lea.hbm %s846_s1, 256 }
  0x36   : > { %p488_p3 = scmp.lt.u32.totalorder %s746_s16, %s846_s1  ;;  %p489_p6 = scmp.lt.u32.totalorder %s487_s27, %s482_s4 }
  0x37   : > { %p485_p11 = pnand %p483_p9, %p454_p5  ;;  %p491_p10 = scmp.lt.u32.totalorder %s482_s4, %s746_s16 }
  0x38   : > { %p490_p4 = por %p489_p6, %p488_p3 }
  0x39   : > { %p486_p13 = pneg %p485_p11 }
  0x3a   : > { %p492_p12 = por %p491_p10, %p490_p4 }
  0x3c   : > { %p493_p1 = pnand %p492_p12, %p486_p13 }
  0x3e   : > { %496 = shalt.err (!%p493_p1)
}
  0x3f   : > { %s497_s25 = scalar_lea.vmem %s167_s19, 32  ;;  %s601_s26 = smov [#allocation5]  }
  0x40   : > { %p498_p2 = scmp.ne.s32.totalorder %s167_s19, %s497_s25  ;;  %s502_s3 = sshll.u32 %s601_s26, 4  ;;  %s503_s3 = int_to_ptr.vmem [resolvable:$false] %s502_s3 }
  0x41   : > { %s504_s8 = scalar_lea.vmem %s503_s3, 64  ;;  %p505_p8 = scmp.lt.s32.totalorder %s167_s19, %s503_s3 }
  0x42   : > { %p500_p9 = pnand %p498_p2, %p454_p5  ;;  %p506_p7 = scmp.lt.s32.totalorder %s504_s8, %s497_s25 }
  0x44   : > { %p501_p11 = pneg %p500_p9  ;;  %p507_p3 = por %p506_p7, %p505_p8 }
  0x46   : > { %p508_p6 = pnand %p507_p3, %p501_p11 }
  0x48   : > { %511 = shalt.err (!%p508_p6)
}
  0x49   : > { %396 = dma.hbm_to_vmem [thread:$0]  (!%p701_p0), %s746_s16, 32, %s167_s19, %s154_s30  }
  0x4a   : > { %p858_p13 = scmp.ne.s32.totalorder %s857_s7, 0 }
  0x4b   : > { %s773_s15 = sand.u32 (!%p858_p13), 1, %s582_s10   ;;  %p859_p5 = scmp.ne.s32.totalorder (!%p858_p13), %s851_s21, 0 }
  0x4c   : > { %175 = sbr.rel (%p858_p13) target bundleno = 120 (0x78), region = 28  ;;  %s375_s18 = sshll.u32 (!%p858_p13), %s773_s15, 1 }
  0x4d   : > { %s178_s4 = scalar_lea.sflag (!%p858_p13), [#allocation3], %s773_s15  ;;  %s181_s6 = scalar_lea.vmem (!%p858_p13), [#allocation2], %s375_s18 }
  0x53   : > { %565 = dma.done.wait (%p859_p5), %s178_s4, 32  }
  0x54   : > { %567 = vsyncadd (%p859_p5), %s178_s4, 4294967264  ;;  %s187_s5 = scalar_lea.sflag [#allocation6], %s773_s15  ;;  %s190_s16 = scalar_lea.vmem [#allocation5], %s375_s18 }
  0x55   : > { %569 = dma.done.wait (%p859_p5), %s187_s5, 32  }
  0x56   : > { %571 = vsyncadd (%p859_p5), %s187_s5, 4294967264  ;;  %s786_s7 = scalar_lea.vmem [#allocation7], %s375_s18  ;;  %v602_v0 = vmov 0.0   ;;  %v221_v1 = vld [vmem:[%s181_s6] sm:$0x3]  ;;  %vm224_vm0 = vcmask 1041408  }
  0x57   : > { %220 = vst [vmem:[%s786_s7] sm:$0x3] %v602_v0  ;;  %v222_v2 = vld [vmem:[%s190_s16] sm:$0x3]  ;;  %vm241_vm1 = vcmask 1040384   ;;  %s379_s21 = sshll.u32 %s590_s12, 5  ;;  %s259_s19 = sshll.u32 %s786_s7, 4  ;;  %s797_s19 = int_to_ptr.vmem [resolvable:$true] %s259_s19 }
  0x58   : > { %v223_v3 = vmul.f32 %v222_v2, %v221_v1  ;;  %v232_v4 = vadd.f32 %v222_v2, %v221_v1  ;;  %s795_s27 = scalar_lea.hbm %s847_s2, %s379_s21  ;;  %s246_s28 = scalar_lea.sflag [#allocation4], %s773_s15 }
  0x59   : > { %s512_s29 = scalar_lea.vmem %s797_s19, 32  ;;  %p860_p0 = scmp.ne.s32.totalorder %s852_s22, 0 }
  0x5a   : > { %v225_v5 = vsel %vm224_vm0, %v223_v3, 0.0  ;;  %v233_v6 = vsel %vm224_vm0, %v232_v4, 0.0  ;;  %p513_p8 = scmp.ne.s32.totalorder %s797_s19, %s512_s29  ;;  %s603_s12 = smov [#allocation7]  }
  0x5b   : > { %v226_v7 = vrot.slane %v225_v5, 4  ;;  %v234_v8 = vrot.slane %v233_v6, 4  ;;  %s516_s25 = sshll.u32 %s603_s12, 4  ;;  %s517_s25 = int_to_ptr.vmem [resolvable:$false] %s516_s25 }
  0x5c   : > { %p514_p7 = pnand %p513_p8, %p860_p0  ;;  %s518_s26 = scalar_lea.vmem %s517_s25, 64 }
  0x5d   : > { %v227_v9 = vadd.f32 %v226_v7, %v225_v5  ;;  %v235_v10 = vadd.f32 %v234_v8, %v233_v6  ;;  %p519_p10 = scmp.lt.s32.totalorder %s797_s19, %s517_s25  ;;  %p520_p12 = scmp.lt.s32.totalorder %s518_s26, %s512_s29 }
  0x5e   : > { %v240_v19 = vld [vmem:[%s786_s7] sm:$0x3]  ;;  %p515_p4 = pneg %p514_p7 }
  0x5f   : > { %v228_v11 = vrot.slane %v227_v9, 2  ;;  %v236_v12 = vrot.slane %v235_v10, 2  ;;  %p521_p1 = por %p520_p12, %p519_p10 }
  0x61   : > { %v229_v13 = vadd.f32 %v228_v11, %v227_v9  ;;  %v237_v14 = vadd.f32 %v236_v12, %v235_v10  ;;  %p522_p2 = pnand %p521_p1, %p515_p4 }
  0x63   : > { %v230_v15 = vrot.slane %v229_v13, 1  ;;  %v238_v16 = vrot.slane %v237_v14, 1 }
  0x65   : > { %v231_v17 = vadd.f32 %v230_v15, %v229_v13  ;;  %v239_v18 = vadd.f32 %v238_v16, %v237_v14 }
  0x67   : > { %v242_v20 = vsel %vm241_vm1, %v231_v17, %v239_v18 }
  0x68   : > { %v243_v21 = vadd.f32 %v242_v20, %v240_v19 }
  0x6a   : > { %244 = vst [vmem:[%s786_s7] sm:$0x3] %v243_v21 }
  0x6b   : > { %525 = shalt.err (!%p522_p2)
}
  0x6c   : > { %s526_s3 = scalar_lea.hbm %s795_s27, 32  ;;  %s530_s18 = scalar_lea.hbm %s847_s2, 64 }
  0x6d   : > { %p527_p9 = scmp.ne.s32.totalorder %s795_s27, %s526_s3  ;;  %p531_p6 = scmp.lt.u32.totalorder %s795_s27, %s847_s2 }
  0x6e   : > { %p532_p13 = scmp.lt.u32.totalorder %s530_s18, %s526_s3  ;;  %p534_p8 = scmp.lt.u32.totalorder %s526_s3, %s795_s27 }
  0x6f   : > { %p528_p11 = pnand %p527_p9, %p860_p0 }
  0x70   : > { %p533_p5 = por %p532_p13, %p531_p6 }
  0x71   : > { %p529_p3 = pneg %p528_p11 }
  0x72   : > { %p535_p7 = por %p534_p8, %p533_p5 }
  0x74   : > { %p536_p4 = pnand %p535_p7, %p529_p3 }
  0x76   : > { %539 = shalt.err (!%p536_p4)
}
  0x77   : > { %388 = dma.vmem_to_hbm [thread:$0]  (%p860_p0), %s797_s19, 32, %s795_s27, %s246_s28  }
  0x78 PF: > { %s271_s5 = sand.u32 1, %s578_s9   ;;  %p861_p10 = scmp.ne.s32.totalorder %s853_s24, 0 }
  0x79   : > { %p862_p12 = scmp.ge.s32.totalorder %s598_s14, 2  ;;  %s272_s16 = scalar_lea.sflag [#allocation4], %s271_s5 }
  0x7b   : > { %p398_p1 = pnand %p862_p12, %p861_p10 }
  0x7d   : > { %573 = dma.done.wait (!%p398_p1), %s272_s16, 32  }
  0x7e   : > { %575 = vsyncadd (!%p398_p1), %s272_s16, 4294967264  ;;  %s21_s14 = sadd.s32 1, %s598_s14   ;;  %s863_s9 = smov %s582_s10 }
  0x7f   : > { %p18_p2 = scmp.ge.s32.totalorder %s21_s14, 4   ;;  %s864_s10 = smov %s586_s11 }
  0x80   : > { %s865_s11 = smov %s675_s23  ;;  %s866_s12 = smov %s594_s13 }
  0x81   : > { %s867_s13 = smov %s869_s17  ;;  %20 = sbr.rel (!%p18_p2) target bundleno = 8 (0x8), region = 90 }
  0x88   :  { %277 = vsyncpa [#allocation3], 1 }
  0x89   :  { %279 = vsyncpa [#allocation3 + $0x1], 1 }
  0x8a   :  { %280 = vsyncpa [#allocation6], 1 }
  0x8b   :  { %282 = vsyncpa [#allocation6 + $0x1], 1 }
  0x8c   :  { %283 = vsyncpa [#allocation4], 1 }
  0x8d   :  { %285 = vsyncpa [#allocation4 + $0x1], 1 }

</bundles_post_ra>
